<compile_context>
chip_gen: v7x
topology: tpu7x:2x2x1
jax: 0.10.0
libtpu: 0.0.40
codegen_flags: <defaults>
</compile_context>

<pallas_src>
import jax
import jax.numpy as jnp
import numpy as np
from jax import lax
from jax.experimental import pallas as pl
from jax.experimental.pallas import tpu as pltpu

# ----------------------------- configuration -------------------------------
B, CIN, H, W = 2, 4, 32, 32          # input NCHW
COUT = 32                            # conv output channels
K, S, P = 7, 4, 4                    # conv kernel / stride / padding
PK, PS = 4, 4                        # maxpool kernel / stride (non-overlapping)
EPS = 1e-5                           # BatchNorm eps (PyTorch default)

assert PK == PS, "pool path assumes non-overlapping windows (module default)"

OH = (H + 2 * P - K) // S + 1        # conv output spatial (9)
OW = (W + 2 * P - K) // S + 1
PH = (OH - PK) // PS + 1             # pooled output spatial (2)
PW = (OW - PK) // PS + 1

N = B * OH * OW                      # true number of conv positions (162)
NPOOL = B * PH * PW * PK * PK        # rows covered by pool windows (128)
NOUT = B * PH * PW                   # pooled rows (8)
KK = CIN * K * K                     # im2col depth (196)

N_PAD = ((N + 7) // 8) * 8           # 168  (sublane aligned, zero rows)
KK_PAD = ((KK + 127) // 128) * 128   # 256  (MXU-aligned contraction dim)
C_PAD = 128                          # lane-dense channel dim

INV_N = 1.0 / N                      # BN stats always use the true N


# --------------------- static im2col index map (host) -----------------------
def _build_index_map():
    """[N_PAD, KK_PAD] int32 indices into flattened padded input (+1 sentinel zero).

    Rows 0..NPOOL-1 : (b, ph, pw, ki, kj) pool-window-major (16 rows / window)
    Rows NPOOL..N-1 : leftover oh/ow strips (BatchNorm statistics only)
    Rows N..N_PAD-1 and cols KK..KK_PAD-1 : sentinel -> appended zero element
    """
    HP, WP = H + 2 * P, W + 2 * P
    sb, sc, sh = CIN * HP * WP, HP * WP, WP
    SENT = B * CIN * HP * WP                      # index of the appended zero

    idx = np.full((N_PAD, KK_PAD), SENT, dtype=np.int32)

    ci = np.arange(CIN)[:, None, None]
    ki = np.arange(K)[None, :, None]
    kj = np.arange(K)[None, None, :]

    def row(b, oh, ow):
        return (b * sb + ci * sc + (oh * S + ki) * sh + (ow * S + kj)).reshape(KK)

    r = 0
    # Pool-covered rows, pool-window-major.
    for b in range(B):
        for ph in range(PH):
            for pw in range(PW):
                for i in range(PK):
                    for j in range(PK):
                        idx[r, :KK] = row(b, ph * PS + i, pw * PS + j)
                        r += 1
    assert r == NPOOL
    # Leftover strips (stats-only).
    for b in range(B):
        for oh in range(PH * PK, OH):
            for ow in range(OW):
                idx[r, :KK] = row(b, oh, ow)
                r += 1
        for oh in range(PH * PK):
            for ow in range(PW * PK, OW):
                idx[r, :KK] = row(b, oh, ow)
                r += 1
    assert r == N
    return idx


_IDX = _build_index_map()


# ------------------------------ Pallas kernel ------------------------------
def img2tok_kernel(p_ref, w_ref, gb_ref, o_ref):
    # Conv2d as one MXU matmul: bf16 [N_PAD, KK_PAD] @ bf16 [KK_PAD, C_PAD],
    # f32 accumulation.  Padded rows/cols are zero -> contribute nothing.
    conv = jnp.dot(p_ref[...], w_ref[...], preferred_element_type=jnp.float32)

    # BatchNorm2d (training-mode batch stats, biased variance) — single f32 sweep.
    s1 = jnp.sum(conv, axis=0, keepdims=True)            # [1, C_PAD]
    s2 = jnp.sum(conv * conv, axis=0, keepdims=True)     # [1, C_PAD]
    mean = s1 * INV_N
    var = jnp.maximum(s2 * INV_N - mean * mean, 0.0)      # guard cancellation
    gamma = gb_ref[0:1, :]                                # [1, C_PAD]
    beta = gb_ref[1:2, :]                                 # [1, C_PAD]
    scale = gamma * lax.rsqrt(var + EPS)                  # EUP rsqrt (f32)
    shift = beta - mean * scale

    # Only pool-covered rows need normalization (strip rows were stats-only).
    bn = conv[:NPOOL, :] * scale + shift                  # [NPOOL, C_PAD]

    # MaxPool2d: each pool window is 16 contiguous, sublane-aligned rows.
    o_ref[...] = jnp.max(bn.reshape(NOUT, PK * PK, C_PAD), axis=1)  # [NOUT, C_PAD]


# ------------------------------- JAX glue ----------------------------------
def prepare_params(w, gamma, beta):
    """One-time parameter prep, hoisted out of the per-call path."""
    w2d = jnp.transpose(w.reshape(COUT, KK))                          # [KK, COUT]
    w2d = jnp.pad(w2d, ((0, KK_PAD - KK), (0, C_PAD - COUT)))         # [KK_PAD, C_PAD]
    w2d = w2d.astype(jnp.bfloat16)                                    # MXU-native
    gb = jnp.stack([gamma, beta], axis=0)                             # [2, COUT]
    gb = jnp.pad(gb, ((0, 0), (0, C_PAD - COUT))).astype(jnp.float32) # [2, C_PAD]
    return w2d, gb


@jax.jit
def image_to_tokens(x, w2d, gb):
    # im2col as a single constant-index gather (bf16, pool-window-major rows,
    # sentinel index -> appended zero for all padding).
    xp = jnp.pad(x, ((0, 0), (0, 0), (P, P), (P, P))).astype(jnp.bfloat16)
    xp_flat = jnp.concatenate([xp.reshape(-1), jnp.zeros((1,), jnp.bfloat16)])
    patches = jnp.take(xp_flat, _IDX, axis=0)                         # [N_PAD, KK_PAD] bf16

    out_flat = pl.pallas_call(
        img2tok_kernel,
        out_shape=jax.ShapeDtypeStruct((NOUT, C_PAD), jnp.float32),
        # No grid: whole-array VMEM blocks, no double-buffering / pipeline overhead.
        in_specs=[
            pl.BlockSpec(memory_space=pltpu.MemorySpace.VMEM),
            pl.BlockSpec(memory_space=pltpu.MemorySpace.VMEM),
            pl.BlockSpec(memory_space=pltpu.MemorySpace.VMEM),
        ],
        out_specs=pl.BlockSpec(memory_space=pltpu.MemorySpace.VMEM),
        cost_estimate=pl.CostEstimate(
            flops=2 * N_PAD * KK_PAD * C_PAD,
            transcendentals=C_PAD,
            bytes_accessed=(N_PAD * KK_PAD + KK_PAD * C_PAD) * 2      # bf16 inputs
                           + 2 * C_PAD * 4 + NOUT * C_PAD * 4),      # f32 gb + out
    )(patches, w2d, gb)

    # [B*PH*PW, C_PAD] -> slice real channels -> NCHW (PyTorch layout)
    out = out_flat[:, :COUT].reshape(B, PH, PW, COUT)
    return jnp.transpose(out, (0, 3, 1, 2))


def reference(x, w, bias, gamma, beta):
    """Pure-JAX reference matching PyTorch semantics (bias included)."""
    conv = lax.conv_general_dilated(
        x, w, window_strides=(S, S), padding=[(P, P), (P, P)],
        dimension_numbers=("NCHW", "OIHW", "NCHW"))
    conv = conv + bias.reshape(1, COUT, 1, 1)
    mean = jnp.mean(conv, axis=(0, 2, 3), keepdims=True)
    var = jnp.mean((conv - mean) ** 2, axis=(0, 2, 3), keepdims=True)
    bn = (conv - mean) / jnp.sqrt(var + EPS)
    bn = bn * gamma.reshape(1, COUT, 1, 1) + beta.reshape(1, COUT, 1, 1)
    return lax.reduce_window(bn, -jnp.inf, lax.max,
                             (1, 1, PK, PK), (1, 1, PS, PS), "VALID")


# --------------------------------- main -------------------------------------
if __name__ == "__main__":
    key = jax.random.PRNGKey(0)
    kx, kw, kb, kg, kbe = jax.random.split(key, 5)

    x = jax.random.normal(kx, (B, CIN, H, W), jnp.float32)
    w = jax.random.normal(kw, (COUT, CIN, K, K), jnp.float32) * 0.05
    bias = jax.random.normal(kb, (COUT,), jnp.float32) * 0.1     # reference only
    gamma = 1.0 + 0.1 * jax.random.normal(kg, (COUT,), jnp.float32)
    beta = 0.1 * jax.random.normal(kbe, (COUT,), jnp.float32)

    # One-time static parameter prep (hoisted out of the per-call path).
    w2d, gb = prepare_params(w, gamma, beta)

    # Conv bias is mathematically cancelled by train-mode BatchNorm, so the
    # kernel never sees it; the reference keeps it to verify the cancellation.
    out = jax.block_until_ready(image_to_tokens(x, w2d, gb))
    ref = jax.block_until_ready(reference(x, w, bias, gamma, beta))

    assert out.shape == (B, COUT, PH, PW), out.shape
    np.testing.assert_allclose(np.asarray(out), np.asarray(ref),
                               rtol=1e-2, atol=1e-2)
    print("KERNEL_OK")
</pallas_src>

<mosaic_0001>
module attributes {stable_mosaic.version = 11 : i64} {
  func.func @img2tok_kernel(%arg0: memref<168x256xbf16, #tpu.memory_space<vmem>>, %arg1: memref<256x128xbf16, #tpu.memory_space<vmem>>, %arg2: memref<2x128xf32, #tpu.memory_space<vmem>>, %arg3: memref<8x128xf32, #tpu.memory_space<vmem>>) attributes {dimension_semantics = [], scalar_prefetch = 0 : i64, scratch_operands = 0 : i64, tpu.core_type = #tpu.core_type<tc>} {
    %c0 = arith.constant 0 : index
    %c0_0 = arith.constant 0 : index
    %0 = vector.load %arg0[%c0, %c0_0] : memref<168x256xbf16, #tpu.memory_space<vmem>>, vector<168x256xbf16>
    %c0_1 = arith.constant 0 : index
    %c0_2 = arith.constant 0 : index
    %1 = vector.load %arg1[%c0_1, %c0_2] : memref<256x128xbf16, #tpu.memory_space<vmem>>, vector<256x128xbf16>
    %cst = arith.constant dense<0.000000e+00> : vector<168x128xf32>
    %2 = tpu.matmul %0, %1, %cst {dimension_numbers = #tpu.dot_dimension_numbers<[1], [0], [0], [1], [0, 0, 1, 1], [], []>} : vector<168x256xbf16>, vector<256x128xbf16>, vector<168x128xf32> -> vector<168x128xf32>
    %cst_3 = arith.constant dense<0.000000e+00> : vector<128xf32>
    %3 = vector.multi_reduction <add>, %2, %cst_3 [0] : vector<168x128xf32> to vector<128xf32>
    %4 = vector.shape_cast %3 : vector<128xf32> to vector<1x128xf32>
    %5 = arith.mulf %2, %2 : vector<168x128xf32>
    %cst_4 = arith.constant dense<0.000000e+00> : vector<128xf32>
    %6 = vector.multi_reduction <add>, %5, %cst_4 [0] : vector<168x128xf32> to vector<128xf32>
    %7 = vector.shape_cast %6 : vector<128xf32> to vector<1x128xf32>
    %cst_5 = arith.constant 0.00617283955 : f32
    %8 = vector.broadcast %cst_5 : f32 to vector<1x128xf32>
    %9 = arith.mulf %4, %8 : vector<1x128xf32>
    %cst_6 = arith.constant 0.00617283955 : f32
    %10 = vector.broadcast %cst_6 : f32 to vector<1x128xf32>
    %11 = arith.mulf %7, %10 : vector<1x128xf32>
    %12 = arith.mulf %9, %9 : vector<1x128xf32>
    %13 = arith.subf %11, %12 : vector<1x128xf32>
    %cst_7 = arith.constant 0.000000e+00 : f32
    %14 = vector.broadcast %cst_7 : f32 to vector<1x128xf32>
    %15 = arith.maximumf %13, %14 : vector<1x128xf32>
    %c0_8 = arith.constant 0 : index
    %c0_9 = arith.constant 0 : index
    %16 = vector.load %arg2[%c0_8, %c0_9] : memref<2x128xf32, #tpu.memory_space<vmem>>, vector<1x128xf32>
    %c1 = arith.constant 1 : index
    %c0_10 = arith.constant 0 : index
    %17 = vector.load %arg2[%c1, %c0_10] : memref<2x128xf32, #tpu.memory_space<vmem>>, vector<1x128xf32>
    %cst_11 = arith.constant 9.99999974E-6 : f32
    %18 = vector.broadcast %cst_11 : f32 to vector<1x128xf32>
    %19 = arith.addf %15, %18 : vector<1x128xf32>
    %20 = math.rsqrt %19 : vector<1x128xf32>
    %21 = arith.mulf %16, %20 : vector<1x128xf32>
    %22 = arith.mulf %9, %21 : vector<1x128xf32>
    %23 = arith.subf %17, %22 : vector<1x128xf32>
    %24 = vector.extract_strided_slice %2 {offsets = [0, 0], sizes = [128, 128], strides = [1, 1]} : vector<168x128xf32> to vector<128x128xf32>
    %25 = vector.broadcast %21 : vector<1x128xf32> to vector<128x128xf32>
    %26 = arith.mulf %24, %25 : vector<128x128xf32>
    %27 = vector.broadcast %23 : vector<1x128xf32> to vector<128x128xf32>
    %28 = arith.addf %26, %27 : vector<128x128xf32>
    %29 = vector.shape_cast %28 : vector<128x128xf32> to vector<8x16x128xf32>
    %cst_12 = arith.constant dense<0xFF800000> : vector<8x128xf32>
    %30 = vector.multi_reduction <maximumf>, %29, %cst_12 [1] : vector<8x16x128xf32> to vector<8x128xf32>
    %c0_13 = arith.constant 0 : index
    %c0_14 = arith.constant 0 : index
    %31 = vector.load %arg3[%c0_13, %c0_14] : memref<8x128xf32, #tpu.memory_space<vmem>>, vector<8x128xf32>
    tpu.vector_store %arg3[%c0_13, %c0_14], %30 {strides = array<i32>} : memref<8x128xf32, #tpu.memory_space<vmem>>, vector<8x128xf32>,
    return
  }
}

</mosaic_0001>

<bundles_post_ra>
// kernel: image_to_tokens.1
= control target key start
LH: loop header
LB: loop body
LE: loop exit
PB: predicated region body
PF: predicated region fallthrough
CT: control target
= control target key end

     0   :  { %s1078_s0 = inlined_call_operand.vmem [shape: bf16[168,256], index: 0, kind: input, shape index: {}]   ;;  %s1079_s1 = inlined_call_operand.vmem [shape: bf16[256,128], index: 1, kind: input, shape index: {}]   ;;  %s1080_s2 = inlined_call_operand.vmem [shape: f32[2,128], index: 2, kind: input, shape index: {}]   ;;  %s1081_s3 = inlined_call_operand.hbm [shape: f32[8,128], index: 3, kind: output, shape index: {}]  }
   0x1   :  { %v748_v0 = vld [vmem:[%s1079_s1 + $0x40] sm:$0xff]   ;;  %v750_v2 = vld [vmem:[%s1079_s1 + $0x48] sm:$0xff]   ;;  %v752_v4 = vld [vmem:[%s1079_s1 + $0x50] sm:$0xff]  }
   0x2   :  { %v749_v1 = vld [vmem:[%s1079_s1] sm:$0xff]   ;;  %649 = vmatprep.subr.bf16.mxu0 %v748_v0  ;;  %731 = vmatprep.subr.bf16.mxu1 %v748_v0  ;;  %v751_v3 = vld [vmem:[%s1079_s1 + $0x8] sm:$0xff]   ;;  %v753_v5 = vld [vmem:[%s1079_s1 + $0x10] sm:$0xff]  }
   0x3   :  { %650 = vmatpush3.bf16.msra.mxu0 %v749_v1  ;;  %739 = vmatpush3.bf16.msra.mxu1 %v749_v1  ;;  %v754_v6 = vld [vmem:[%s1079_s1 + $0x58] sm:$0xff]   ;;  %v756_v8 = vld [vmem:[%s1079_s1 + $0x60] sm:$0xff]   ;;  %v758_v10 = vld [vmem:[%s1079_s1 + $0x68] sm:$0xff]  }
   0x4   :  { %651 = vmatprep.subr.bf16.mxu0 %v750_v2  ;;  %732 = vmatprep.subr.bf16.mxu1 %v750_v2  ;;  %v755_v7 = vld [vmem:[%s1079_s1 + $0x18] sm:$0xff]   ;;  %v757_v9 = vld [vmem:[%s1079_s1 + $0x20] sm:$0xff]   ;;  %v759_v12 = vld [vmem:[%s1079_s1 + $0x28] sm:$0xff]  }
   0x5   :  { %v766_v11 = vld [vmem:[%s1078_s0 + $0x4] ss:$8 sps:$4 sm:$0xff]   ;;  %v760_v13 = vld [vmem:[%s1079_s1 + $0x70] sm:$0xff]   ;;  %v762_v16 = vld [vmem:[%s1079_s1 + $0x78] sm:$0xff]  }
   0x6   :  { %304 = vmatprep.mubr.bf16.mxu0 %v766_v11  ;;  %v778_v14 = vld [vmem:[%s1078_s0 + $0x64] ss:$8 sps:$4 sm:$0xff]   ;;  %v761_v15 = vld [vmem:[%s1079_s1 + $0x30] sm:$0xff]   ;;  %v763_v17 = vld [vmem:[%s1079_s1 + $0x38] sm:$0xff]  }
   0x7   :  { %652 = vmatpush3.bf16.msra.mxu0 %v751_v3  ;;  %740 = vmatpush3.bf16.msra.mxu1 %v751_v3 }
   0x8   :  { %653 = vmatprep.subr.bf16.mxu0 %v752_v4  ;;  %733 = vmatprep.subr.bf16.mxu1 %v752_v4 }
   0x9   :  { %352 = vmatprep.mubr.bf16.mxu1 %v778_v14 }
   0xb   :  { %654 = vmatpush3.bf16.msra.mxu0 %v753_v5  ;;  %741 = vmatpush3.bf16.msra.mxu1 %v753_v5 }
   0xc   :  { %655 = vmatprep.subr.bf16.mxu0 %v754_v6  ;;  %734 = vmatprep.subr.bf16.mxu1 %v754_v6 }
   0xf   :  { %656 = vmatpush3.bf16.msra.mxu0 %v755_v7  ;;  %742 = vmatpush3.bf16.msra.mxu1 %v755_v7 }
  0x10   :  { %657 = vmatprep.subr.bf16.mxu0 %v756_v8  ;;  %735 = vmatprep.subr.bf16.mxu1 %v756_v8 }
  0x13   :  { %658 = vmatpush3.bf16.msra.mxu0 %v757_v9  ;;  %743 = vmatpush3.bf16.msra.mxu1 %v757_v9 }
  0x14   :  { %659 = vmatprep.subr.bf16.mxu0 %v758_v10  ;;  %736 = vmatprep.subr.bf16.mxu1 %v758_v10 }
  0x17   :  { %660 = vmatpush3.bf16.msra.mxu0 %v759_v12  ;;  %744 = vmatpush3.bf16.msra.mxu1 %v759_v12 }
  0x18   :  { %661 = vmatprep.subr.bf16.mxu0 %v760_v13  ;;  %737 = vmatprep.subr.bf16.mxu1 %v760_v13 }
  0x1b   :  { %662 = vmatpush3.bf16.msra.mxu0 %v761_v15  ;;  %745 = vmatpush3.bf16.msra.mxu1 %v761_v15 }
  0x1c   :  { %663 = vmatprep.subr.bf16.mxu0 %v762_v16  ;;  %738 = vmatprep.subr.bf16.mxu1 %v762_v16 }
  0x1d   :  { %8 = vsyncpa [#allocation3], 0  ;;  %v764_v18 = vld [vmem:[%s1078_s0] ss:$8 sps:$4 sm:$0xff]   ;;  %v767_v19 = vld [vmem:[%s1078_s0 + $0x14] ss:$8 sps:$4 sm:$0xff]  }
  0x1e   :  { %v776_v20 = vld [vmem:[%s1078_s0 + $0x60] ss:$8 sps:$4 sm:$0xff]   ;;  %v782_v21 = vld [vmem:[%s1078_s0 + $0x74] ss:$8 sps:$4 sm:$0xff]   ;;  %v769_v22 = vld [vmem:[%s1078_s0 + $0x10] ss:$8 sps:$4 sm:$0xff]  }
  0x1f   :  { %664 = vmatpush3.bf16.msra.mxu0 %v763_v17  ;;  %746 = vmatpush3.bf16.msra.mxu1 %v763_v17  ;;  %v770_v23 = vld [vmem:[%s1078_s0 + $0x24] ss:$8 sps:$4 sm:$0xff]   ;;  %v784_v24 = vld [vmem:[%s1078_s0 + $0x70] ss:$8 sps:$4 sm:$0xff]   ;;  %v772_v26 = vld [vmem:[%s1078_s0 + $0x20] ss:$8 sps:$4 sm:$0xff]  }
  0x20   :  { %v788_v25 = vld [vmem:[%s1078_s0 + $0x84] ss:$8 sps:$4 sm:$0xff]   ;;  %v773_v27 = vld [vmem:[%s1078_s0 + $0x34] ss:$8 sps:$4 sm:$0xff]   ;;  %v790_v28 = vld [vmem:[%s1078_s0 + $0x80] ss:$8 sps:$4 sm:$0xff]  }
  0x21   :  { %v791_v29 = vld [vmem:[%s1078_s0 + $0x94] ss:$8 sps:$4 sm:$0xff]   ;;  %v36_v30 = vld [vmem:[%s1078_s0 + $0xa0] sm:$0xff]  ;;  %v775_v31 = vld [vmem:[%s1078_s0 + $0x30] ss:$8 sps:$4 sm:$0xff]   ;;  %vm581_vm0 = vcmask 1041409  }
  0x22   :  { %305 = vmatmul.mubr.bf16.vlgmr.msra.gmra.mrb[0].mxu0 %v764_v18  ;;  %353 = vmatmul.mubr.bf16.vlgmr.msra.gmra.mrb[0].mxu1 %v776_v20  ;;  %v779_v32 = vld [vmem:[%s1078_s0 + $0x44] ss:$8 sps:$4 sm:$0xff]   ;;  %v793_v33 = vld [vmem:[%s1078_s0 + $0x90] ss:$8 sps:$4 sm:$0xff]   ;;  %v632_v34 = vcombine.high %v36_v30, %v36_v30  ;;  %v781_v35 = vld [vmem:[%s1078_s0 + $0x40] ss:$8 sps:$4 sm:$0xff]   ;;  %v631_v37 = vcombine.low %v36_v30, %v36_v30 }
  0x23   :  { %312 = vmatprep.mubr.bf16.mxu0 %v767_v19  ;;  %360 = vmatprep.mubr.bf16.mxu1 %v782_v21  ;;  %v785_v36 = vld [vmem:[%s1078_s0 + $0x54] ss:$8 sps:$4 sm:$0xff]   ;;  %v787_v38 = vld [vmem:[%s1078_s0 + $0x50] ss:$8 sps:$4 sm:$0xff]   ;;  %vm583_vm1 = vcmask 1042434   ;;  %vm585_vm2 = vcmask 1043459  }
  0x24   :  { %vm587_vm3 = vcmask 1044484   ;;  %vm589_vm4 = vcmask 1045509   ;;  %vm591_vm5 = vcmask 1046534   ;;  %vm593_vm6 = vcmask 1047559  }
  0x2a   :  { %313 = vmatmul.mubr.bf16.gmra.mrb[4].mxu0 %v769_v22  ;;  %361 = vmatmul.mubr.bf16.gmra.mrb[4].mxu1 %v784_v24 }
  0x2b   :  { %320 = vmatprep.mubr.bf16.mxu0 %v770_v23  ;;  %368 = vmatprep.mubr.bf16.mxu1 %v788_v25 }
  0x32   :  { %321 = vmatmul.mubr.bf16.gmra.mrb[8].mxu0 %v772_v26  ;;  %369 = vmatmul.mubr.bf16.gmra.mrb[8].mxu1 %v790_v28 }
  0x33   :  { %328 = vmatprep.mubr.bf16.mxu0 %v773_v27  ;;  %376 = vmatprep.mubr.bf16.mxu1 %v791_v29 }
  0x3a   :  { %329 = vmatmul.mubr.bf16.gmra.mrb[12].mxu0 %v775_v31  ;;  %377 = vmatmul.mubr.bf16.gmra.mrb[12].mxu1 %v793_v33 }
  0x3b   :  { %336 = vmatprep.mubr.bf16.mxu0 %v779_v32  ;;  %384 = vmatprep.mubr.bf16.mxu1 %v632_v34 }
  0x42   :  { %337 = vmatmul.mubr.bf16.gmra.mrb[16].mxu0 %v781_v35  ;;  %385 = vmatmul.mubr.bf16.gmra.mrb[16].mxu1 %v631_v37 }
  0x43   :  { %344 = vmatprep.mubr.bf16.mxu0 %v785_v36 }
  0x4a   :  { %345 = vmatmul.mubr.bf16.gmra.mrb[20].mxu0 %v787_v38 }
  0xf5   :  { %v665_v39 = vpop.f32.mrb[0].mxu0  ;;  %v701_v41 = vpop.f32.mrb[0].mxu1 }
  0xf6   :  { %v666_v40 = vpop.f32.mrb[1].mxu0  ;;  %v702_v44 = vpop.f32.mrb[1].mxu1 }
  0xf7   :  { %v954_v42 = vadd.f32 %v666_v40, %v665_v39  ;;  %v668_v43 = vpop.f32.mrb[2].mxu0  ;;  %v956_v46 = vadd.f32 %v702_v44, %v701_v41  ;;  %v704_v47 = vpop.f32.mrb[2].mxu1 }
  0xf8   :  { %v669_v45 = vpop.f32.mrb[3].mxu0  ;;  %v705_v49 = vpop.f32.mrb[3].mxu1 }
  0xf9   :  { %v958_v48 = vadd.f32 %v669_v45, %v668_v43  ;;  %v960_v50 = vadd.f32 %v705_v49, %v704_v47  ;;  %v418_v3 = vmul.f32 %v954_v42, %v954_v42 }
  0xfb   :  { %v419_v63 = vmul.f32 %v958_v48, %v958_v48  ;;  %v392_v4 = vadd.f32 %v958_v48, %v954_v42 }
  0xfd   :  { %v671_v51 = vpop.f32.mrb[4].mxu0  ;;  %v707_v53 = vpop.f32.mrb[4].mxu1  ;;  %v439_v12 = vadd.f32 %v419_v63, %v418_v3 }
  0xfe   :  { %v672_v52 = vpop.f32.mrb[5].mxu0  ;;  %v708_v56 = vpop.f32.mrb[5].mxu1 }
  0xff   :  { %v962_v54 = vadd.f32 %v672_v52, %v671_v51  ;;  %v674_v55 = vpop.f32.mrb[6].mxu0  ;;  %v964_v58 = vadd.f32 %v708_v56, %v707_v53  ;;  %v710_v59 = vpop.f32.mrb[6].mxu1 }
 0x100   :  { %v675_v57 = vpop.f32.mrb[7].mxu0  ;;  %v711_v61 = vpop.f32.mrb[7].mxu1 }
 0x101   :  { %v966_v60 = vadd.f32 %v675_v57, %v674_v55  ;;  %v968_v62 = vadd.f32 %v711_v61, %v710_v59  ;;  %v420_v5 = vmul.f32 %v962_v54, %v962_v54  ;;  %v393_v13 = vadd.f32 %v962_v54, %v392_v4 }
 0x103   :  { %v440_v17 = vadd.f32 %v439_v12, %v420_v5  ;;  %v421_v18 = vmul.f32 %v966_v60, %v966_v60  ;;  %v394_v19 = vadd.f32 %v966_v60, %v393_v13 }
 0x105   :  { %v677_v0 = vpop.f32.mrb[8].mxu0  ;;  %v713_v2 = vpop.f32.mrb[8].mxu1  ;;  %v441_v24 = vadd.f32 %v440_v17, %v421_v18 }
 0x106   :  { %v678_v1 = vpop.f32.mrb[9].mxu0  ;;  %v714_v8 = vpop.f32.mrb[9].mxu1 }
 0x107   :  { %v978_v6 = vadd.f32 %v678_v1, %v677_v0  ;;  %v680_v7 = vpop.f32.mrb[10].mxu0  ;;  %v980_v10 = vadd.f32 %v714_v8, %v713_v2  ;;  %v716_v11 = vpop.f32.mrb[10].mxu1 }
 0x108   :  { %v681_v9 = vpop.f32.mrb[11].mxu0  ;;  %v717_v15 = vpop.f32.mrb[11].mxu1 }
 0x109   :  { %v983_v14 = vadd.f32 %v681_v9, %v680_v7  ;;  %v985_v16 = vadd.f32 %v717_v15, %v716_v11  ;;  %v422_v20 = vmul.f32 %v978_v6, %v978_v6  ;;  %v395_v25 = vadd.f32 %v978_v6, %v394_v19 }
 0x10b   :  { %v442_v32 = vadd.f32 %v441_v24, %v422_v20  ;;  %v423_v33 = vmul.f32 %v983_v14, %v983_v14  ;;  %v396_v37 = vadd.f32 %v983_v14, %v395_v25  ;;  %v431_v24 = vmul.f32 %v960_v50, %v960_v50 }
 0x10d   :  { %v683_v21 = vpop.f32.mrb[12].mxu0  ;;  %v719_v23 = vpop.f32.mrb[12].mxu1  ;;  %v443_v39 = vadd.f32 %v442_v32, %v423_v33  ;;  %v433_v32 = vmul.f32 %v968_v62, %v968_v62 }
 0x10e   :  { %v684_v22 = vpop.f32.mrb[13].mxu0  ;;  %v720_v28 = vpop.f32.mrb[13].mxu1 }
 0x10f   :  { %v993_v26 = vadd.f32 %v684_v22, %v683_v21  ;;  %v686_v27 = vpop.f32.mrb[14].mxu0  ;;  %v721_v30 = vadd.f32 %v720_v28, %v719_v23  ;;  %v722_v31 = vpop.f32.mrb[14].mxu1  ;;  %v430_v21 = vmul.f32 %v956_v46, %v956_v46  ;;  %v432_v28 = vmul.f32 %v964_v58, %v964_v58 }
 0x110   :  { %v687_v29 = vpop.f32.mrb[15].mxu0  ;;  %v723_v35 = vpop.f32.mrb[15].mxu1 }
 0x111   :  { %v997_v34 = vadd.f32 %v687_v29, %v686_v27  ;;  %v724_v36 = vadd.f32 %v723_v35, %v722_v31  ;;  %v424_v38 = vmul.f32 %v993_v26, %v993_v26  ;;  %v397_v40 = vadd.f32 %v993_v26, %v396_v37 }
 0x112   :  { %v434_v37 = vmul.f32 %v980_v10, %v980_v10 }
 0x113   :  { %v444_v45 = vadd.f32 %v443_v39, %v424_v38  ;;  %v425_v47 = vmul.f32 %v997_v34, %v997_v34  ;;  %v398_v57 = vadd.f32 %v997_v34, %v397_v40 }
 0x115   :  { %v689_v41 = vpop.f32.mrb[16].mxu0  ;;  %v725_v44 = vpop.f32.mrb[16].mxu1  ;;  %v445_v0 = vadd.f32 %v444_v45, %v425_v47  ;;  %v436_v47 = vmul.f32 %v721_v30, %v721_v30 }
 0x116   :  { %v690_v43 = vpop.f32.mrb[17].mxu0  ;;  %v726_v52 = vpop.f32.mrb[17].mxu1 }
 0x117   :  { %v1005_v49 = vadd.f32 %v690_v43, %v689_v41  ;;  %v692_v51 = vpop.f32.mrb[18].mxu0  ;;  %v727_v55 = vadd.f32 %v726_v52, %v725_v44  ;;  %v728_v56 = vpop.f32.mrb[18].mxu1  ;;  %v435_v41 = vmul.f32 %v985_v16, %v985_v16 }
 0x118   :  { %v693_v53 = vpop.f32.mrb[19].mxu0  ;;  %v729_v63 = vpop.f32.mrb[19].mxu1 }
 0x119   :  { %v426_v59 = vmul.f32 %v1005_v49, %v1005_v49  ;;  %v1010_v61 = vadd.f32 %v693_v53, %v692_v51  ;;  %v399_v1 = vadd.f32 %v1005_v49, %v398_v57  ;;  %v437_v53 = vmul.f32 %v724_v36, %v724_v36 }
 0x11a   :  { %v438_v56 = vmul.f32 %v727_v55, %v727_v55 }
 0x11b   :  { %v446_v2 = vadd.f32 %v445_v0, %v426_v59  ;;  %v427_v3 = vmul.f32 %v1010_v61, %v1010_v61  ;;  %v400_v7 = vadd.f32 %v1010_v61, %v399_v1 }
 0x11d   :  { %v695_v4 = vpop.f32.mrb[20].mxu0  ;;  %v447_v12 = vadd.f32 %v446_v2, %v427_v3 }
 0x11e   :  { %v696_v5 = vpop.f32.mrb[21].mxu0 }
 0x11f   :  { %v1016_v8 = vadd.f32 %v696_v5, %v695_v4  ;;  %v698_v9 = vpop.f32.mrb[22].mxu0 }
 0x120   :  { %v699_v11 = vpop.f32.mrb[23].mxu0 }
 0x121   :  { %v401_v13 = vadd.f32 %v1016_v8, %v400_v7  ;;  %v428_v15 = vmul.f32 %v1016_v8, %v1016_v8  ;;  %v1021_v17 = vadd.f32 %v699_v11, %v698_v9 }
 0x123   :  { %v448_v18 = vadd.f32 %v447_v12, %v428_v15  ;;  %v402_v19 = vadd.f32 %v1021_v17, %v401_v13  ;;  %v429_v20 = vmul.f32 %v1021_v17, %v1021_v17 }
 0x125   :  { %v403_v22 = vadd.f32 %v956_v46, %v402_v19  ;;  %v449_v23 = vadd.f32 %v448_v18, %v429_v20 }
 0x127   :  { %v404_v25 = vadd.f32 %v960_v50, %v403_v22  ;;  %v450_v27 = vadd.f32 %v449_v23, %v430_v21  ;;  %v470_v21 = vld [vmem:[%s1080_s2] sm:$0x1] }
 0x129   :  { %v451_v29 = vadd.f32 %v450_v27, %v431_v24  ;;  %v405_v31 = vadd.f32 %v964_v58, %v404_v25  ;;  %v471_v25 = vld [vmem:[%s1080_s2 + $0x1] sm:$0x1]  ;;  %s822_s2 = smov [#allocation2]  }
 0x12a   :  { %s603_s6 = sshll.u32 %s822_s2, 4  ;;  %s604_s6 = int_to_ptr.vmem [resolvable:$true] %s603_s6 }
 0x12b   :  { %v406_v33 = vadd.f32 %v968_v62, %v405_v31  ;;  %v452_v35 = vadd.f32 %v451_v29, %v432_v28  ;;  %s798_s7 = scalar_lea.vmem %s604_s6, 128  ;;  %p803_p1 = scmp.lt.s32.totalorder %s604_s6, %s604_s6 }
 0x12c   :  { %p799_p0 = scmp.ne.s32.totalorder %s604_s6, %s798_s7  ;;  %p804_p2 = scmp.lt.s32.totalorder %s798_s7, %s798_s7 }
 0x12d   :  { %v407_v38 = vadd.f32 %v980_v10, %v406_v33  ;;  %v453_v39 = vadd.f32 %v452_v35, %v433_v32 }
 0x12e   :  { %p805_p3 = por %p804_p2, %p803_p1 }
 0x12f   :  { %v408_v40 = vadd.f32 %v985_v16, %v407_v38  ;;  %v454_v43 = vadd.f32 %v453_v39, %v434_v37 }
 0x130   :  { %p806_p4 = pnand %p805_p3, %p799_p0 }
 0x131   :  { %v455_v44 = vadd.f32 %v454_v43, %v435_v41  ;;  %v409_v45 = vadd.f32 %v721_v30, %v408_v40 }
 0x133   :  { %v456_v51 = vadd.f32 %v455_v44, %v436_v47  ;;  %v410_v52 = vadd.f32 %v724_v36, %v409_v45 }
 0x135   :  { %v457_v57 = vadd.f32 %v456_v51, %v437_v53  ;;  %v411_v59 = vadd.f32 %v727_v55, %v410_v52  ;;  %v477_v55 = vlaneseq }
 0x137   :  { %v412_v63 = vrot.slane %v411_v59, 4  ;;  %v458_v0 = vadd.f32 %v457_v57, %v438_v56  ;;  %v478_v20 = vshrl.u32 %v477_v55, 7 }
 0x139   :  { %v413_v1 = vadd.f32 %v412_v63, %v411_v59  ;;  %v459_v10 = vrot.slane %v458_v0, 4  ;;  %v479_v22 = vsub.s32 0, %v478_v20 }
 0x13b   :  { %v414_v2 = vrot.slane %v413_v1, 2  ;;  %v460_v3 = vadd.f32 %v459_v10, %v458_v0 }
 0x13d   :  { %v415_v4 = vadd.f32 %v414_v2, %v413_v1  ;;  %v461_v5 = vrot.slane %v460_v3, 2 }
 0x13f   :  { %v416_v7 = vrot.slane %v415_v4, 1  ;;  %v462_v16 = vadd.f32 %v461_v5, %v460_v3 }
 0x141   :  { %v417_v9 = vadd.f32 %v416_v7, %v415_v4  ;;  %v463_v11 = vrot.slane %v462_v16, 1 }
 0x143   :  { %v464_v12 = vadd.f32 %v463_v11, %v462_v16  ;;  %v465_v30 = vmul.f32 0.0061728396, %v417_v9 }
 0x145   :  { %v466_v13 = vmul.f32 0.0061728396, %v464_v12  ;;  %v467_v15 = vmul.f32 %v465_v30, %v465_v30 }
 0x147   :  { %v468_v36 = vsub.f32 %v466_v13, %v467_v15 }
 0x149   :  { %v469_v18 = vmax.f32 %v468_v36, 0.0 }
 0x14b   :  { %v472_v19 = vadd.f32 1e-05, %v469_v18 }
 0x14d   :  { %796 = vrsqrt.f32 %v472_v19 }
 0x157   :  { %v797_v23 = vpop.eup %796 }
 0x158   :  { %v474_v24 = vmul.f32 %v797_v23, %v470_v21 }
 0x15a   :  { %v475_v27 = vmul.f32 %v474_v24, %v465_v30  ;;  %v480_v28 = vrot.slane %v474_v24, %v479_v22 }
 0x15c   :  { %v476_v29 = vsub.f32 %v471_v25, %v475_v27  ;;  %v481_v31 = vmul.f32 %v954_v42, %v480_v28  ;;  %v482_v32 = vmul.f32 %v958_v48, %v480_v28  ;;  %v483_v33 = vmul.f32 %v962_v54, %v480_v28 }
 0x15d   :  { %v484_v35 = vmul.f32 %v966_v60, %v480_v28  ;;  %v485_v37 = vmul.f32 %v978_v6, %v480_v28  ;;  %v486_v38 = vmul.f32 %v983_v14, %v480_v28  ;;  %v487_v39 = vmul.f32 %v993_v26, %v480_v28 }
 0x15e   :  { %v500_v40 = vrot.slane %v476_v29, %v479_v22  ;;  %v488_v41 = vmul.f32 %v997_v34, %v480_v28  ;;  %v489_v43 = vmul.f32 %v1005_v49, %v480_v28  ;;  %v490_v44 = vmul.f32 %v1010_v61, %v480_v28 }
 0x15f   :  { %v491_v42 = vmul.f32 %v1016_v8, %v480_v28  ;;  %v492_v48 = vmul.f32 %v1021_v17, %v480_v28  ;;  %v493_v54 = vmul.f32 %v956_v46, %v480_v28  ;;  %v494_v60 = vmul.f32 %v960_v50, %v480_v28 }
 0x160   :  { %v495_v6 = vmul.f32 %v964_v58, %v480_v28  ;;  %v496_v14 = vmul.f32 %v968_v62, %v480_v28  ;;  %v501_v26 = vadd.f32 %v500_v40, %v481_v31  ;;  %v502_v45 = vadd.f32 %v500_v40, %v482_v32 }
 0x161   :  { %v503_v47 = vadd.f32 %v500_v40, %v483_v33  ;;  %v504_v34 = vadd.f32 %v500_v40, %v484_v35  ;;  %v505_v51 = vadd.f32 %v500_v40, %v485_v37  ;;  %v506_v49 = vadd.f32 %v500_v40, %v486_v38 }
 0x162   :  { %v507_v52 = vadd.f32 %v500_v40, %v487_v39  ;;  %v508_v61 = vadd.f32 %v500_v40, %v488_v41  ;;  %v509_v53 = vadd.f32 %v500_v40, %v489_v43  ;;  %v510_v8 = vadd.f32 %v500_v40, %v490_v44 }
 0x163   :  { %v511_v56 = vadd.f32 %v500_v40, %v491_v42  ;;  %v512_v17 = vadd.f32 %v500_v40, %v492_v48  ;;  %v513_v57 = vadd.f32 %v500_v40, %v493_v54  ;;  %v514_v46 = vadd.f32 %v500_v40, %v494_v60 }
 0x164   :  { %v515_v59 = vadd.f32 %v500_v40, %v495_v6  ;;  %v516_v50 = vadd.f32 %v500_v40, %v496_v14  ;;  %v517_v63 = vmax.f32 %v501_v26, %v502_v45  ;;  %v524_v58 = vmax.f32 %v503_v47, %v504_v34 }
 0x165   :  { %v531_v0 = vmax.f32 %v505_v51, %v506_v49  ;;  %v538_v62 = vmax.f32 %v507_v52, %v508_v61  ;;  %v545_v1 = vmax.f32 %v509_v53, %v510_v8  ;;  %v552_v10 = vmax.f32 %v511_v56, %v512_v17 }
 0x166   :  { %v518_v2 = vrot.slane %v517_v63, 4  ;;  %v525_v3 = vrot.slane %v524_v58, 4  ;;  %v559_v4 = vmax.f32 %v513_v57, %v514_v46  ;;  %v566_v5 = vmax.f32 %v515_v59, %v516_v50 }
 0x167   :  { %v532_v7 = vrot.slane %v531_v0, 4  ;;  %v539_v16 = vrot.slane %v538_v62, 4  ;;  %v546_v9 = vrot.slane %v545_v1, 4  ;;  %v553_v11 = vrot.slane %v552_v10, 4 }
 0x168   :  { %v519_v12 = vmax.f32 %v517_v63, %v518_v2  ;;  %v526_v30 = vmax.f32 %v524_v58, %v525_v3  ;;  %v560_v13 = vrot.slane %v559_v4, 4  ;;  %v567_v15 = vrot.slane %v566_v5, 4 }
 0x169   :  { %v533_v36 = vmax.f32 %v531_v0, %v532_v7  ;;  %v540_v18 = vmax.f32 %v538_v62, %v539_v16  ;;  %v547_v19 = vmax.f32 %v545_v1, %v546_v9  ;;  %v554_v55 = vmax.f32 %v552_v10, %v553_v11 }
 0x16a   :  { %v520_v20 = vrot.slane %v519_v12, 2  ;;  %v527_v21 = vrot.slane %v526_v30, 2  ;;  %v561_v22 = vmax.f32 %v559_v4, %v560_v13  ;;  %v568_v23 = vmax.f32 %v566_v5, %v567_v15 }
 0x16b   :  { %v534_v24 = vrot.slane %v533_v36, 2  ;;  %v541_v25 = vrot.slane %v540_v18, 2  ;;  %v548_v27 = vrot.slane %v547_v19, 2  ;;  %v555_v28 = vrot.slane %v554_v55, 2 }
 0x16c   :  { %v521_v29 = vmax.f32 %v519_v12, %v520_v20  ;;  %v528_v31 = vmax.f32 %v526_v30, %v527_v21  ;;  %v562_v32 = vrot.slane %v561_v22, 2  ;;  %v569_v33 = vrot.slane %v568_v23, 2 }
 0x16d   :  { %v535_v35 = vmax.f32 %v533_v36, %v534_v24  ;;  %v542_v37 = vmax.f32 %v540_v18, %v541_v25  ;;  %v549_v38 = vmax.f32 %v547_v19, %v548_v27  ;;  %v556_v39 = vmax.f32 %v554_v55, %v555_v28 }
 0x16e   :  { %v522_v40 = vrot.slane %v521_v29, 1  ;;  %v529_v41 = vrot.slane %v528_v31, 1  ;;  %v563_v43 = vmax.f32 %v561_v22, %v562_v32  ;;  %v570_v44 = vmax.f32 %v568_v23, %v569_v33 }
 0x16f   :  { %v536_v42 = vrot.slane %v535_v35, 1  ;;  %v543_v48 = vrot.slane %v542_v37, 1  ;;  %v550_v54 = vrot.slane %v549_v38, 1  ;;  %v557_v14 = vrot.slane %v556_v39, 1 }
 0x170   :  { %v523_v60 = vmax.f32 %v521_v29, %v522_v40  ;;  %v530_v6 = vmax.f32 %v528_v31, %v529_v41  ;;  %v564_v45 = vrot.slane %v563_v43, 1  ;;  %v571_v34 = vrot.slane %v570_v44, 1 }
 0x171   :  { %v537_v26 = vmax.f32 %v535_v35, %v536_v42  ;;  %v544_v47 = vmax.f32 %v542_v37, %v543_v48  ;;  %v551_v49 = vmax.f32 %v549_v38, %v550_v54  ;;  %v558_v61 = vmax.f32 %v556_v39, %v557_v14 }
 0x172   :  { %v582_v51 = vsel %vm581_vm0, %v530_v6, %v523_v60  ;;  %v565_v8 = vmax.f32 %v563_v43, %v564_v45  ;;  %v572_v17 = vmax.f32 %v570_v44, %v571_v34 }
 0x173   :  { %v584_v52 = vsel %vm583_vm1, %v537_v26, %v582_v51 }
 0x174   :  { %v586_v53 = vsel %vm585_vm2, %v544_v47, %v584_v52 }
 0x175   :  { %v588_v56 = vsel %vm587_vm3, %v551_v49, %v586_v53 }
 0x176   :  { %v590_v57 = vsel %vm589_vm4, %v558_v61, %v588_v56 }
 0x177   :  { %v592_v46 = vsel %vm591_vm5, %v565_v8, %v590_v57 }
 0x178   :  { %v594_v59 = vsel %vm593_vm6, %v572_v17, %v592_v46 }
 0x179   :  { %596 = vst [vmem:[#allocation2] sm:$0xff] %v594_v59 }
 0x17a   :  { %809 = shalt.err (!%p806_p4)
}
 0x17b   :  { %s810_s10 = scalar_lea.hbm %s1081_s3, 128 }
 0x17c   :  { %p811_p5 = scmp.ne.s32.totalorder %s1081_s3, %s810_s10  ;;  %p814_p6 = scmp.lt.u32.totalorder %s810_s10, %s1081_s3 }
 0x17e   :  { %p816_p7 = pnand %p814_p6, %p811_p5 }
 0x180   :  { %819 = shalt.err (!%p816_p7)
}
 0x181   :  { %606 = dma.vmem_to_hbm [thread:$0]  %s604_s6, 128, %s1081_s3, [#allocation3]  }
 0x182   :  { %820 = dma.done.wait [#allocation3], 128  }
 0x183   :  { %821 = vsyncadd [#allocation3], 4294967168 }
 0x184   :  { %610 = vsyncpa [#allocation3], 1 }

</bundles_post_ra>
